<compile_context>
chip_gen: v7x
topology: tpu7x:2x2x1
jax: 0.10.0
libtpu: 0.0.40
codegen_flags: <defaults>
</compile_context>

<pallas_src>
import functools

import jax
import jax.numpy as jnp
from jax import lax
from jax.experimental import pallas as pl
from jax.experimental.pallas import tpu as pltpu

_MIB = 1024 * 1024
_TILE_TARGET_SMALL_VMEM = 4 * _MIB   # per-input-buffer byte target on 64 MiB VMEM (v7x)
_TILE_TARGET_LARGE_VMEM = 8 * _MIB   # per-input-buffer byte target on 128 MiB VMEM (v5e/v6e)
_SMALL_SINGLE_BLOCK_BYTES = 4 * _MIB  # below this the gridless single-block kernel is cheapest


# ---------------------------------------------------------------------------
# Hardware-aware sizing helpers
# ---------------------------------------------------------------------------
def _vmem_capacity_bytes():
    try:
        return int(pltpu.get_tpu_info().vmem_capacity_bytes)
    except Exception:
        return 128 * _MIB  # conservative default (v5e/v6e-class)


def _round_up(n, m):
    return ((n + m - 1) // m) * m


def _choose_block_b(B, C, capacity):
    """Rows per block so one input tile is ~TARGET bytes (generation-aware)."""
    target = _TILE_TARGET_SMALL_VMEM if capacity <= 64 * _MIB else _TILE_TARGET_LARGE_VMEM
    bb = max(8, (target // (C * 4)) // 8 * 8)   # multiple of 8 (sublane tiling)
    return int(min(bb, _round_up(B, 8)))        # never bigger than the (padded) batch


def _vmem_limit_bytes(block_b, C, capacity):
    # double-buffered input tile + f32 intermediates + headroom, capped below capacity
    block_bytes_f32 = block_b * C * 4
    want = 8 * block_bytes_f32 + 8 * _MIB
    return int(min(max(want, 32 * _MIB), capacity * 3 // 4))


# ---------------------------------------------------------------------------
# Kernels
# ---------------------------------------------------------------------------
def _myloss_single_block_kernel(x_ref, o_ref):
    """Whole (B, C) array resident in VMEM; scalar loss written to SMEM."""
    x = x_ref[...].astype(jnp.float32)
    row_mean = jnp.mean(x, axis=1, keepdims=True)                     # (B, 1)
    row_var = jnp.mean((x - row_mean) ** 2, axis=1, keepdims=True)    # (B, 1), unbiased=False
    o_ref[0, 0] = -jnp.mean(row_var)                                  # scalar -> SMEM


def _myloss_tiled_kernel(x_ref, o_ref, *, total_rows, block_b):
    """Per-block partial sums of squared deviations, row reductions on the MXU.

    x_ref : (block_b, C) input tile (may contain garbage tail rows past total_rows)
    o_ref : (8, C) per-block partial; every one of the 8 rows equals the column
            sum of (x - row_mean)^2 over the valid rows of this block, so the
            wrapper divides the grand total by 8.
    """
    i = pl.program_id(0)
    x = x_ref[...].astype(jnp.float32)                                # (TB, C)
    c = x.shape[-1]

    # Row sums on the MXU (frees the XLU lane-reduce path).
    ones_c = jnp.ones((c, 1), jnp.float32)
    row_sum = jnp.dot(x, ones_c, preferred_element_type=jnp.float32)  # (TB, 1)
    row_mean = row_sum * jnp.float32(1.0 / c)

    # Mask tail rows of the last (partial) block before they enter any sum.
    row_ids = i * block_b + lax.broadcasted_iota(jnp.int32, (block_b, 1), 0)
    d = jnp.where(row_ids < total_rows, x - row_mean, jnp.float32(0.0))
    sq = d * d

    # Collapse the block's rows on the MXU as well -> lane-dense (8, C) partial.
    ones_r = jnp.ones((8, block_b), jnp.float32)
    o_ref[...] = jnp.dot(ones_r, sq, preferred_element_type=jnp.float32)


# ---------------------------------------------------------------------------
# Pallas wrappers
# ---------------------------------------------------------------------------
def _loss_single_block(x):
    """Gridless whole-array kernel (small B*C)."""
    out = pl.pallas_call(
        _myloss_single_block_kernel,
        out_shape=jax.ShapeDtypeStruct((1, 1), jnp.float32),
        in_specs=[pl.BlockSpec(memory_space=pltpu.MemorySpace.VMEM)],
        out_specs=pl.BlockSpec(memory_space=pltpu.MemorySpace.SMEM),
    )(x)
    return out[0, 0]


def _loss_tiled(x, block_b):
    """Batch-tiled kernel.  Works for any B (tail rows masked in-kernel)."""
    B, C = x.shape
    assert block_b % 8 == 0, "block_b must be a multiple of 8"
    num_blocks = -(-B // block_b)          # ceil(B / block_b)
    capacity = _vmem_capacity_bytes()

    kernel = functools.partial(_myloss_tiled_kernel, total_rows=B, block_b=block_b)
    partials = pl.pallas_call(
        kernel,
        out_shape=jax.ShapeDtypeStruct((num_blocks, 8, C), jnp.float32),
        grid=(num_blocks,),
        in_specs=[pl.BlockSpec((block_b, C), lambda i: (i, 0))],
        out_specs=pl.BlockSpec((None, 8, C), lambda i: (i, 0, 0)),
        compiler_params=pltpu.CompilerParams(
            dimension_semantics=("parallel",),   # independent blocks -> v7x megacore
            vmem_limit_bytes=_vmem_limit_bytes(block_b, C, capacity)),
    )(x)
    # Tiny final reduction in plain JAX: each partial row was replicated 8x.
    total_ssd = jnp.sum(partials) / jnp.float32(8.0)
    return -(total_ssd / jnp.float32(C * B))


def _my_loss_pallas_forward(x):
    B, C = x.shape
    capacity = _vmem_capacity_bytes()
    nbytes_f32 = B * C * 4
    if nbytes_f32 <= min(_SMALL_SINGLE_BLOCK_BYTES, capacity // 16):
        return _loss_single_block(x)
    block_b = _choose_block_b(B, C, capacity)
    return _loss_tiled(x, block_b)


# ---------------------------------------------------------------------------
# Differentiable entry point
# ---------------------------------------------------------------------------
@jax.custom_vjp
def _my_loss_core(x):
    return _my_loss_pallas_forward(x)


def _my_loss_core_fwd(x):
    return _my_loss_pallas_forward(x), x


def _my_loss_core_bwd(x, g):
    # dL/dx_ij = -(2 / (B*C)) * (x_ij - row_mean_i)
    xf = x.astype(jnp.float32)
    B, C = x.shape
    row_mean = jnp.mean(xf, axis=1, keepdims=True)
    dx = (-2.0 / (B * C)) * (xf - row_mean)
    return ((g * dx).astype(x.dtype),)


_my_loss_core.defvjp(_my_loss_core_fwd, _my_loss_core_bwd)


def my_loss(inp, target=None, *, force_pallas=False):
    """Pallas implementation of MyLoss.forward.

    inp:    (B, C) float array (logits / network output).
    target: ignored (the PyTorch module never reads it).
    force_pallas: bypass the pure-jnp fast path for tiny / lane-sparse shapes.
    """
    del target  # unused by MyLoss.forward
    B, C = inp.shape
    if not force_pallas and (C < 128 or B * C <= 16384):
        # Tiny or lane-sparse (the actual PGD case B=32, C=10): a fused XLA
        # reduction beats any standalone pallas_call and lets grad-only PGD
        # loops fuse/elide the forward.
        xf = inp.astype(jnp.float32)
        row_mean = jnp.mean(xf, axis=1, keepdims=True)
        return -jnp.mean(jnp.mean((xf - row_mean) ** 2, axis=1))
    return _my_loss_core(inp)


# ---------------------------------------------------------------------------
# Self-test
# ---------------------------------------------------------------------------
if __name__ == "__main__":
    key = jax.random.PRNGKey(0)
    k_x, k_t, k_big = jax.random.split(key, 3)

    # Shapes matching the module's usage: PGD attack batch_size=32, nb_classes=10.
    B, C = 32, 10
    x = jax.random.normal(k_x, (B, C), dtype=jnp.float32)
    target = jax.random.randint(k_t, (B,), 0, C, dtype=jnp.int32)  # unused by the loss

    ref = -jnp.mean(jnp.var(x, axis=1, ddof=0))

    # Dispatcher (tiny / lane-sparse -> fused jnp path).
    loss_d = jax.block_until_ready(my_loss(x, target))
    assert jnp.allclose(loss_d, ref, rtol=1e-5, atol=1e-6), (loss_d, ref)

    # Pallas gridless single-block kernel on the same tiny shape.
    loss_p = jax.block_until_ready(_loss_single_block(x))
    assert jnp.allclose(loss_p, ref, rtol=1e-5, atol=1e-6), (loss_p, ref)

    # Gradient through the Pallas forward (custom VJP) vs autodiff reference.
    grad = jax.block_until_ready(
        jax.grad(lambda a: my_loss(a, target, force_pallas=True))(x))
    grad_ref = jax.grad(lambda a: -jnp.mean(jnp.var(a, axis=1, ddof=0)))(x)
    assert jnp.allclose(grad, grad_ref, rtol=1e-5, atol=1e-6)

    # Batch-tiled kernel: non-divisible B exercises tail-row masking, lane-dense C,
    # per-block parallel partials, MXU row reductions.  Default-precision MXU
    # passes (bf16 operand rounding, f32 accumulation) -> slightly looser tolerance.
    Bb, Cb = 1000, 256
    xb = jax.random.normal(k_big, (Bb, Cb), dtype=jnp.float32)
    loss_t = jax.block_until_ready(_loss_tiled(xb, block_b=128))
    ref_t = -jnp.mean(jnp.var(xb, axis=1, ddof=0))
    assert jnp.allclose(loss_t, ref_t, rtol=1e-3, atol=1e-4), (loss_t, ref_t)

    print("KERNEL_OK")
</pallas_src>

<mosaic_0001>
module attributes {stable_mosaic.version = 11 : i64} {
  func.func @_myloss_single_block_kernel(%arg0: memref<32x10xf32, #tpu.memory_space<vmem>>, %arg1: memref<1x1xf32, #tpu.memory_space<smem>>) attributes {dimension_semantics = [], scalar_prefetch = 0 : i64, scratch_operands = 0 : i64, tpu.core_type = #tpu.core_type<tc>} {
    %c0 = arith.constant 0 : index
    %c0_0 = arith.constant 0 : index
    %0 = vector.load %arg0[%c0, %c0_0] : memref<32x10xf32, #tpu.memory_space<vmem>>, vector<32x10xf32>
    %cst = arith.constant dense<0.000000e+00> : vector<32xf32>
    %1 = vector.multi_reduction <add>, %0, %cst [1] : vector<32x10xf32> to vector<32xf32>
    %2 = vector.shape_cast %1 : vector<32xf32> to vector<32x1xf32>
    %cst_1 = arith.constant 1.000000e+01 : f32
    %3 = vector.broadcast %cst_1 : f32 to vector<32x1xf32>
    %4 = arith.divf %2, %3 : vector<32x1xf32>
    %5 = vector.broadcast %4 : vector<32x1xf32> to vector<32x10xf32>
    %6 = arith.subf %0, %5 : vector<32x10xf32>
    %7 = arith.mulf %6, %6 : vector<32x10xf32>
    %cst_2 = arith.constant dense<0.000000e+00> : vector<32xf32>
    %8 = vector.multi_reduction <add>, %7, %cst_2 [1] : vector<32x10xf32> to vector<32xf32>
    %9 = vector.shape_cast %8 : vector<32xf32> to vector<32x1xf32>
    %cst_3 = arith.constant 1.000000e+01 : f32
    %10 = vector.broadcast %cst_3 : f32 to vector<32x1xf32>
    %11 = arith.divf %9, %10 : vector<32x1xf32>
    %12 = vector.shape_cast %11 : vector<32x1xf32> to vector<1x32x1xf32>
    %cst_4 = arith.constant dense<0.000000e+00> : vector<1xf32>
    %13 = vector.multi_reduction <add>, %12, %cst_4 [1, 2] : vector<1x32x1xf32> to vector<1xf32>
    %14 = vector.shape_cast %13 : vector<1xf32> to vector<1x1x1xf32>
    %15 = vector.extract %14[0, 0, 0] : f32 from vector<1x1x1xf32>
    %cst_5 = arith.constant 3.200000e+01 : f32
    %16 = arith.divf %15, %cst_5 : f32
    %cst_6 = arith.constant 0.000000e+00 : f32
    %17 = arith.subf %cst_6, %16 : f32
    %c0_7 = arith.constant 0 : index
    %c0_8 = arith.constant 0 : index
    %18 = memref.load %arg1[%c0_7, %c0_8] : memref<1x1xf32, #tpu.memory_space<smem>>
    memref.store %17, %arg1[%c0_7, %c0_8] : memref<1x1xf32, #tpu.memory_space<smem>>
    return
  }
}

</mosaic_0001>

<bundles_post_ra>
// kernel: tpu_custom_call.1
= control target key start
LH: loop header
LB: loop body
LE: loop exit
PB: predicated region body
PF: predicated region fallthrough
CT: control target
= control target key end

     0   :  { %vm13_vm0 = vcmask 80896   ;;  %s149_s0 = inlined_call_operand.vmem [shape: f32[32,10], index: 0, kind: input, shape index: {}]   ;;  %s150_s1 = inlined_call_operand.hbm [shape: f32[1,1], index: 1, kind: output, shape index: {}]  }
   0x1   :  { %v9_v0 = vld [vmem:[%s149_s0] sm:$0xff]  ;;  %v11_v1 = vld [vmem:[%s149_s0 + $0x10] sm:$0xff]  ;;  %v10_v2 = vld [vmem:[%s149_s0 + $0x8] sm:$0xff] }
   0x2   :  { %v14_v3 = vsel %vm13_vm0, %v9_v0, 0.0  ;;  %v20_v4 = vsel %vm13_vm0, %v11_v1, 0.0  ;;  %v12_v5 = vld [vmem:[%s149_s0 + $0x18] sm:$0xff] }
   0x3   :  { %6 = vsyncpa [#allocation3], 0  ;;  %15 = vadd.xlane.f32.xlu0 %v14_v3  ;;  %21 = vadd.xlane.f32.xlu1 %v20_v4  ;;  %v17_v6 = vsel %vm13_vm0, %v10_v2, 0.0  ;;  %v23_v7 = vsel %vm13_vm0, %v12_v5, 0.0  ;;  %vm55_vm1 = vcmask 7168   ;;  %s94_s18 = scalar_lea.hbm %s150_s1, 16 }
   0x4   :  { %p95_p0 = scmp.ne.s32.totalorder %s150_s1, %s94_s18  ;;  %p98_p1 = scmp.lt.u32.totalorder %s94_s18, %s150_s1 }
   0x6   :  { %p100_p2 = pnand %p98_p1, %p95_p0 }
   0x7   :  { %18 = vadd.xlane.f32.xlu0 %v17_v6  ;;  %24 = vadd.xlane.f32.xlu1 %v23_v7 }
  0x90   :  { %v16_v8 = vpop.xlane.xlu0 %15  ;;  %v22_v9 = vpop.xlane.xlu1 %21 }
  0x91   :  { %v27_v10 = vmul.f32 0.1, %v16_v8  ;;  %v29_v11 = vmul.f32 0.1, %v22_v9 }
  0x93   :  { %v31_v12 = vsub.f32 %v9_v0, %v27_v10  ;;  %v33_v13 = vsub.f32 %v11_v1, %v29_v11 }
  0x94   :  { %v19_v14 = vpop.xlane.xlu0 %18  ;;  %v25_v15 = vpop.xlane.xlu1 %24 }
  0x95   :  { %v28_v16 = vmul.f32 0.1, %v19_v14  ;;  %v30_v17 = vmul.f32 0.1, %v25_v15  ;;  %v35_v18 = vmul.f32 %v31_v12, %v31_v12  ;;  %v37_v19 = vmul.f32 %v33_v13, %v33_v13 }
  0x97   :  { %v32_v20 = vsub.f32 %v10_v2, %v28_v16  ;;  %v34_v21 = vsub.f32 %v12_v5, %v30_v17  ;;  %v39_v22 = vsel %vm13_vm0, %v35_v18, 0.0  ;;  %v45_v23 = vsel %vm13_vm0, %v37_v19, 0.0 }
  0x98   :  { %40 = vadd.xlane.f32.xlu0 %v39_v22 }
  0x99   :  { %v36_v24 = vmul.f32 %v32_v20, %v32_v20  ;;  %v38_v25 = vmul.f32 %v34_v21, %v34_v21 }
  0x9b   :  { %v42_v26 = vsel %vm13_vm0, %v36_v24, 0.0  ;;  %v48_v27 = vsel %vm13_vm0, %v38_v25, 0.0 }
  0x9c   :  { %46 = vadd.xlane.f32.xlu0 %v45_v23  ;;  %43 = vadd.xlane.f32.xlu1 %v42_v26 }
  0xa0   :  { %49 = vadd.xlane.f32.xlu1 %v48_v27 }
 0x125   :  { %v41_v28 = vpop.xlane.xlu0 %40 }
 0x126   :  { %v51_v29 = vmul.f32 0.1, %v41_v28 }
 0x128   :  { %v56_v34 = vsel %vm55_vm1, %v51_v29, 0.0 }
 0x129   :  { %v44_v30 = vpop.xlane.xlu1 %43  ;;  %v47_v31 = vpop.xlane.xlu0 %46 }
 0x12a   :  { %v52_v32 = vmul.f32 0.1, %v44_v30  ;;  %v53_v33 = vmul.f32 0.1, %v47_v31 }
 0x12c   :  { %v57_v35 = vsel %vm55_vm1, %v52_v32, 0.0  ;;  %v59_v38 = vsel %vm55_vm1, %v53_v33, 0.0 }
 0x12d   :  { %v58_v36 = vadd.f32 %v57_v35, %v56_v34  ;;  %v50_v37 = vpop.xlane.xlu1 %49 }
 0x12e   :  { %v54_v39 = vmul.f32 0.1, %v50_v37 }
 0x12f   :  { %v60_v40 = vadd.f32 %v59_v38, %v58_v36 }
 0x130   :  { %v61_v41 = vsel %vm55_vm1, %v54_v39, 0.0 }
 0x131   :  { %v62_v42 = vadd.f32 %v61_v41, %v60_v40 }
 0x133   :  { %63 = vadd.xlane.f32.xlu0 %v62_v42 }
 0x1c0   :  { %v64_v43 = vpop.xlane.xlu0 %63 }
 0x1c1   :  { %v65_v44 = vrot.slane %v64_v43, 4 }
 0x1c3   :  { %v66_v45 = vadd.f32 %v65_v44, %v64_v43 }
 0x1c5   :  { %v67_v46 = vrot.slane %v66_v45, 2 }
 0x1c7   :  { %v68_v47 = vadd.f32 %v67_v46, %v66_v45 }
 0x1c9   :  { %v69_v48 = vrot.slane %v68_v47, 1 }
 0x1cb   :  { %v70_v49 = vadd.f32 %v69_v48, %v68_v47 }
 0x1cd   :  { %91 = vpush %v70_v49 }
 0x1fe   :  { %s92_s0 = spop %91 }
 0x1ff   :  { %s74_s14 = smul.f32 0.03125, %s92_s0 }
 0x201   :  { %s75_s15 = ssub.f32 0.0, %s74_s14 }
 0x203   :  { %77 = sst [smem:[#allocation2]] %s75_s15 }
 0x204   :  { %103 = shalt.err (!%p100_p2)
}
 0x205   :  { %s106_s23 = smov [#allocation2]  }
 0x206   :  { %85 = dma.smem_to_hbm %s106_s23, 16, %s150_s1, [#allocation3]  }
 0x207   :  { %104 = dma.done.wait [#allocation3], 16  }
 0x208   :  { %105 = vsyncadd [#allocation3], 4294967280 }
 0x209   :  { %89 = sfence }
 0x20a   :  { %90 = vsyncpa [#allocation3], 1 }

</bundles_post_ra>
